<compile_context>
chip_gen: v6e
topology: v6e:2x2x1
jax: 0.10.0
libtpu: 0.0.40
codegen_flags: <defaults>
</compile_context>

<pallas_src>
import jax
import jax.numpy as jnp
from jax.experimental import pallas as pl
from jax.experimental.pallas import tpu as pltpu


def _temporal_embedding_kernel(idx_ref, tab_ref, out_ref):
    """Fused dual-gather + add as a single two-hot MXU matmul.

    idx_ref : (2, tn) int32  row 0 = day-table row, row 1 = week-table row (pre-offset by T)
    tab_ref : (F, K)  f32    [time_day ; time_week ; zero-pad]^T, VMEM-resident across the grid
    out_ref : (F, tn) f32    lane-dense output tile (F rows, flattened B*N lanes)
    """
    K = tab_ref.shape[1]
    tn = idx_ref.shape[1]

    day_idx = idx_ref[0:1, :]     # (1, tn)
    week_idx = idx_ref[1:2, :]    # (1, tn)

    # Combined (transposed) two-hot: two set bits per column -> one dot does
    # gather(day) + gather(week) in a single MXU pass.  Padded lanes carry
    # idx = -1, so their columns are all-zero and the output there is 0.
    iota_k = jax.lax.broadcasted_iota(jnp.int32, (K, tn), 0)
    onehot = jnp.logical_or(iota_k == day_idx, iota_k == week_idx).astype(jnp.float32)

    out_ref[...] = jnp.dot(
        tab_ref[...], onehot,
        preferred_element_type=jnp.float32,
        precision=jax.lax.Precision.HIGHEST)


def _round_up(x, m):
    return ((x + m - 1) // m) * m


def _pick_lane_tile(l128, cap=8192):
    """Lane tile for the flattened B*N axis.  `l128` is a multiple of 128.

    Prefers >= 2 grid steps (v7x has 2 TensorCores) while keeping tiles
    lane-dense (multiple of 128) and capped so VMEM stays small on every
    generation (v5e 16 MiB scoped default, v7x 64 MiB physical).
    """
    if l128 <= 128:
        return 128
    half = _round_up(-(-l128 // 2), 128)   # ceil(l128/2), rounded to 128
    return min(cap, half)


def temporal_embedding(x, time_day, time_week, time):
    """x: (B, T_seq, N, C) f32 -> (B, F, N, 1) f32, matching the PyTorch module."""
    B, _, N, _ = x.shape
    T, F = time_day.shape
    W = time_week.shape[0]

    # --- wrapper-side layout plumbing (all glue, no compute) ---------------
    # Precompute int32 table-row indices (clamped -- deliberate divergence
    # from PyTorch only for out-of-range inputs), flatten (B, N) -> L lanes.
    day_idx = jnp.clip((x[:, -1, :, 1] * float(time)).astype(jnp.int32), 0, T - 1)
    week_idx = jnp.clip(x[:, -1, :, 2].astype(jnp.int32), 0, W - 1) + T
    L = B * N
    idx = jnp.stack([day_idx.reshape(L), week_idx.reshape(L)], axis=0)   # (2, L) int32

    # Lane-dense padding of the flattened axis.
    tn = _pick_lane_tile(_round_up(L, 128))
    L_pad = _round_up(L, tn)
    idx = jnp.pad(idx, ((0, 0), (0, L_pad - L)), constant_values=-1)     # (2, L_pad)

    # Fused gather table: concat day+week rows, zero-pad the contraction dim
    # to exactly 64 (or the next multiple of 8 above T+W), pre-transposed to
    # (F, K) so the kernel emits a lane-dense (F, tn) tile per grid step.
    K = max(64, _round_up(T + W, 8))
    table = jnp.concatenate([time_day, time_week], axis=0)               # (T+W, F)
    table = jnp.pad(table, ((0, K - (T + W)), (0, 0)))                   # (K, F)
    table_t = jnp.transpose(table).astype(jnp.float32)                   # (F, K)

    grid = (L_pad // tn,)

    # Explicit VMEM budget: double-buffered in/out tiles + onehot + table + margin.
    vmem_bytes = (
        2 * (2 * tn * 4)          # idx tiles (int32), double-buffered
        + 2 * (F * tn * 4)        # out tiles, double-buffered
        + 2 * (F * K * 4)         # resident table (budget 2 buffers to be safe)
        + (K * tn * 4)            # onehot intermediate
        + (8 << 20)               # headroom for compiler temporaries
    )

    out_fl = pl.pallas_call(
        _temporal_embedding_kernel,
        out_shape=jax.ShapeDtypeStruct((F, L_pad), jnp.float32),
        grid_spec=pltpu.PrefetchScalarGridSpec(
            num_scalar_prefetch=0,
            grid=grid,
            in_specs=[
                # per-lane-tile int32 indices
                pl.BlockSpec((2, tn), lambda i: (0, i)),
                # tiny fused table, resident across the whole grid
                pl.BlockSpec((F, K), lambda i: (0, 0)),
            ],
            out_specs=pl.BlockSpec((F, tn), lambda i: (0, i)),
        ),
        compiler_params=pltpu.CompilerParams(
            dimension_semantics=("parallel",),
            vmem_limit_bytes=int(vmem_bytes)),
        cost_estimate=pl.CostEstimate(
            flops=2 * L_pad * K * F,
            transcendentals=0,
            bytes_accessed=(2 * L_pad + F * K + F * L_pad) * 4),
    )(idx, table_t)

    # Strip lane padding, unflatten, and add trailing unit dim:
    # (F, L_pad) -> (F, B, N) -> (B, F, N, 1).
    out = out_fl[:, :L].reshape(F, B, N)
    return jnp.transpose(out, (1, 0, 2))[..., None]


def _xavier_uniform(key, shape, dtype=jnp.float32):
    fan_out, fan_in = shape  # 2-D param: (rows, cols) -> torch fan_out, fan_in
    bound = (6.0 / (fan_in + fan_out)) ** 0.5
    return jax.random.uniform(key, shape, dtype, minval=-bound, maxval=bound)


if __name__ == "__main__":
    B, T_seq, N, C = 2, 8, 16, 3
    TIME, FEATURES = 48, 32

    key = jax.random.PRNGKey(0)
    k_td, k_tw, k_x0, k_day, k_week = jax.random.split(key, 5)

    # Deterministic parameter init (module __init__ shapes).
    time_day = _xavier_uniform(k_td, (TIME, FEATURES))
    time_week = _xavier_uniform(k_tw, (7, FEATURES))

    # Synthetic input x: feature 0 arbitrary, feature 1 = time-of-day fraction
    # in [0,1), feature 2 = day-of-week index in {0..6}.
    x0 = jax.random.normal(k_x0, (B, T_seq, N))
    x1 = jax.random.uniform(k_day, (B, T_seq, N), minval=0.0, maxval=0.999)
    x2 = jax.random.randint(k_week, (B, T_seq, N), 0, 7).astype(jnp.float32)
    x = jnp.stack([x0, x1, x2], axis=-1).astype(jnp.float32)  # (B, T_seq, N, 3)

    out = temporal_embedding(x, time_day, time_week, TIME)
    out = jax.block_until_ready(out)

    # Pure-JAX reference (same semantics as the PyTorch forward).
    day_idx = (x[:, -1, :, 1] * TIME).astype(jnp.int32)
    week_idx = x[:, -1, :, 2].astype(jnp.int32)
    ref = jnp.take(time_day, day_idx, axis=0) + jnp.take(time_week, week_idx, axis=0)
    ref = jnp.transpose(ref, (0, 2, 1))[..., None]

    assert out.shape == (B, FEATURES, N, 1), out.shape
    assert jnp.allclose(out, ref, atol=1e-6), "mismatch vs reference"

    print("KERNEL_OK")
</pallas_src>

<mosaic_0001>
module attributes {stable_mosaic.version = 11 : i64} {
  func.func @_temporal_embedding_kernel(%arg0: i32, %arg1: memref<2x128xi32, #tpu.memory_space<vmem>>, %arg2: memref<32x64xf32, #tpu.memory_space<vmem>>, %arg3: memref<32x128xf32, #tpu.memory_space<vmem>>) attributes {dimension_semantics = [#tpu.dimension_semantics<parallel>], iteration_bounds = array<i64: 1>, scalar_prefetch = 0 : i64, scratch_operands = 0 : i64, tpu.core_type = #tpu.core_type<tc>, window_params = [{transform_indices = @transform_0, window_bounds = array<i64: 2, 128>}, {pipeline_mode = #tpu.pipeline_mode<synchronous>, transform_indices = @transform_1, window_bounds = array<i64: 32, 64>}, {transform_indices = @transform_2, window_bounds = array<i64: 32, 128>}]} {
    %c0 = arith.constant 0 : index
    %c0_0 = arith.constant 0 : index
    %0 = vector.load %arg1[%c0, %c0_0] : memref<2x128xi32, #tpu.memory_space<vmem>>, vector<1x128xi32>
    %c1 = arith.constant 1 : index
    %c0_1 = arith.constant 0 : index
    %1 = vector.load %arg1[%c1, %c0_1] : memref<2x128xi32, #tpu.memory_space<vmem>>, vector<1x128xi32>
    %2 = tpu.iota {dimensions = array<i32: 0>} : vector<64x128xi32>
    %3 = vector.broadcast %0 : vector<1x128xi32> to vector<64x128xi32>
    %4 = arith.cmpi eq, %2, %3 : vector<64x128xi32>
    %5 = vector.broadcast %1 : vector<1x128xi32> to vector<64x128xi32>
    %6 = arith.cmpi eq, %2, %5 : vector<64x128xi32>
    %7 = arith.ori %4, %6 : vector<64x128xi1>
    %8 = arith.extui %7 : vector<64x128xi1> to vector<64x128xi32>
    %9 = arith.sitofp %8 : vector<64x128xi32> to vector<64x128xf32>
    %c0_2 = arith.constant 0 : index
    %c0_3 = arith.constant 0 : index
    %10 = vector.load %arg2[%c0_2, %c0_3] : memref<32x64xf32, #tpu.memory_space<vmem>>, vector<32x64xf32>
    %cst = arith.constant dense<0.000000e+00> : vector<32x128xf32>
    %11 = tpu.matmul %10, %9, %cst {dimension_numbers = #tpu.dot_dimension_numbers<[1], [0], [0], [1], [0, 0, 1, 1], [], []>, precision = #tpu.contract_precision<fp32>} : vector<32x64xf32>, vector<64x128xf32>, vector<32x128xf32> -> vector<32x128xf32>
    %c0_4 = arith.constant 0 : index
    %c0_5 = arith.constant 0 : index
    %12 = vector.load %arg3[%c0_4, %c0_5] : memref<32x128xf32, #tpu.memory_space<vmem>>, vector<32x128xf32>
    tpu.vector_store %arg3[%c0_4, %c0_5], %11 {strides = array<i32>} : memref<32x128xf32, #tpu.memory_space<vmem>>, vector<32x128xf32>,
    return
  }
  func.func @transform_0(%arg0: i32) -> (i32, i32) {
    %c0_i32 = arith.constant 0 : i32
    %c0_i32_0 = arith.constant 0 : i32
    return %c0_i32, %arg0 : i32, i32
  }
  func.func @transform_1(%arg0: i32) -> (i32, i32) {
    %c0_i32 = arith.constant 0 : i32
    %c0_i32_0 = arith.constant 0 : i32
    %c0_i32_1 = arith.constant 0 : i32
    return %c0_i32, %c0_i32_0 : i32, i32
  }
  func.func @transform_2(%arg0: i32) -> (i32, i32) {
    %c0_i32 = arith.constant 0 : i32
    %c0_i32_0 = arith.constant 0 : i32
    return %c0_i32, %arg0 : i32, i32
  }
}

</mosaic_0001>

<bundles_post_ra>
// kernel: tpu_custom_call.1
= control target key start
LH: loop header
LB: loop body
LE: loop exit
PB: predicated region body
PF: predicated region fallthrough
CT: control target
= control target key end

     0   :  { %7 = vsyncpa [#allocation3], 0  ;;  %s1549_s0 = inlined_call_operand.hbm [shape: s32[2,128], index: 0, kind: input, shape index: {}]   ;;  %s1550_s1 = inlined_call_operand.hbm [shape: f32[32,64], index: 1, kind: input, shape index: {}]   ;;  %s1551_s2 = inlined_call_operand.hbm [shape: f32[32,128], index: 2, kind: output, shape index: {}]  }
   0x1   :  { %8 = vsyncpa [#allocation6], 0 }
   0x2   :  { %9 = vsyncpa [#allocation4], 0  ;;  %s1113_s9 = smov [#allocation2]   ;;  %s1114_s11 = smov [#allocation5]  }
   0x3   :  { %s16_s10 = sshll.u32 %s1113_s9, 4  ;;  %s25_s12 = sshll.u32 %s1114_s11, 4  ;;  %s17_s10 = int_to_ptr.vmem [resolvable:$true] %s16_s10  ;;  %s26_s12 = int_to_ptr.vmem [resolvable:$true] %s25_s12 }
   0x4   :  { %s1055_s13 = scalar_lea.vmem %s17_s10, 32  ;;  %p1060_p1 = scmp.lt.s32.totalorder %s17_s10, %s17_s10 }
   0x5   :  { %p1056_p0 = scmp.ne.s32.totalorder %s17_s10, %s1055_s13  ;;  %p1061_p2 = scmp.lt.s32.totalorder %s1055_s13, %s1055_s13 }
   0x7   :  { %p1062_p3 = por %p1061_p2, %p1060_p1 }
   0x9   :  { %p1063_p4 = pnand %p1062_p3, %p1056_p0 }
   0xb   :  { %1066 = shalt.err (!%p1063_p4)
}
   0xc   :  { %19 = dma.hbm_to_vmem [thread:$0]  %s1549_s0, 32, %s17_s10, [#allocation3]  }
   0xd   :  { %s1075_s16 = scalar_lea.vmem %s26_s12, 512  ;;  %p1080_p6 = scmp.lt.s32.totalorder %s26_s12, %s26_s12 }
   0xe   :  { %p1076_p5 = scmp.ne.s32.totalorder %s26_s12, %s1075_s16  ;;  %p1081_p7 = scmp.lt.s32.totalorder %s1075_s16, %s1075_s16 }
  0x10   :  { %p1082_p8 = por %p1081_p7, %p1080_p6 }
  0x12   :  { %p1083_p9 = pnand %p1082_p8, %p1076_p5 }
  0x14   :  { %1086 = shalt.err (!%p1083_p9)
}
  0x15   :  { %s1115_s17 = smov 128   ;;  %s1116_s18 = smov 8  }
  0x16   :  { %31 = dma.hbm_to_vmem [thread:$0]  %s1550_s1, 512, %s26_s12, [#allocation6], %s1115_s17, %s1115_s17, %s1116_s18  }
  0x17   :  { %1107 = dma.done.wait [#allocation3], 32  }
  0x18   :  { %1108 = vsyncadd [#allocation3], 4294967264 }
  0x19   :  { %1109 = dma.done.wait [#allocation6], 512  }
  0x1a   :  { %1110 = vsyncadd [#allocation6], 4294966784  ;;  %v40_v0 = vlaneseq  ;;  %v1152_v8 = vld [vmem:[#allocation2] ss:$0 sm:$0xff]  ;;  %v1154_v9 = vld [vmem:[#allocation2 + $0x1] ss:$0 sm:$0xff] }
  0x1b   :  { %vm101_vm0 = vcmask 523264   ;;  %v1117_v12 = vmov 1.0   ;;  %v1118_v14 = vmov 0.0   ;;  %v97_v19 = vld [vmem:[#allocation5] sm:$0xff]  ;;  %v98_v20 = vld [vmem:[#allocation5 + $0x8] sm:$0xff]  ;;  %v99_v51 = vld [vmem:[#allocation5 + $0x10] sm:$0xff] }
  0x1c   :  { %v1144_v1 = vshrl.u32 %v40_v0, 7  ;;  %v103_v31 = vsel %vm101_vm0, %v97_v19, 0  ;;  %v106_v32 = vsel %vm101_vm0, %v98_v20, 0  ;;  %v100_v60 = vld [vmem:[#allocation5 + $0x18] sm:$0xff]  ;;  %v109_v0 = vsel %vm101_vm0, %v99_v51, 0  ;;  %s1119_s0 = smov [#allocation7]  }
  0x1d   :  { %v1262_v35 = vand.u32 4294901760, %v103_v31  ;;  %v1264_v36 = vand.u32 4294901760, %v106_v32  ;;  %s789_s1 = sshll.u32 %s1119_s0, 4  ;;  %s790_s1 = int_to_ptr.vmem [resolvable:$true] %s789_s1 }
  0x1e   :  { %v48_v2 = vadd.s32 56, %v1144_v1  ;;  %v47_v3 = vadd.s32 48, %v1144_v1  ;;  %v46_v4 = vadd.s32 40, %v1144_v1  ;;  %v45_v5 = vadd.s32 32, %v1144_v1  ;;  %s1087_s21 = scalar_lea.vmem %s790_s1, 512  ;;  %p1092_p11 = scmp.lt.s32.totalorder %s790_s1, %s790_s1 }
  0x1f   :  { %v44_v6 = vadd.s32 24, %v1144_v1  ;;  %v43_v7 = vadd.s32 16, %v1144_v1  ;;  %v42_v10 = vadd.s32 8, %v1144_v1  ;;  %v1294_v44 = vsub.f32 %v103_v31, %v1262_v35  ;;  %946 = vmatprep.mubr.f32.mxu1 %v1262_v35  ;;  %p1088_p10 = scmp.ne.s32.totalorder %s790_s1, %s1087_s21  ;;  %p1093_p12 = scmp.lt.s32.totalorder %s1087_s21, %s1087_s21 }
  0x20   :  { %vm60_vm1 = vcmp.eq.s32.totalorder %v48_v2, %v1152_v8  ;;  %vm72_vm2 = vcmp.eq.s32.totalorder %v48_v2, %v1154_v9  ;;  %vm59_vm3 = vcmp.eq.s32.totalorder %v47_v3, %v1152_v8  ;;  %vm71_vm4 = vcmp.eq.s32.totalorder %v47_v3, %v1154_v9 }
  0x21   :  { %vm1161_vm5 = vmor %vm60_vm1, %vm72_vm2  ;;  %vm58_vm6 = vcmp.eq.s32.totalorder %v46_v4, %v1152_v8  ;;  %vm70_vm7 = vcmp.eq.s32.totalorder %v46_v4, %v1154_v9  ;;  %vm57_vm8 = vcmp.eq.s32.totalorder %v45_v5, %v1152_v8  ;;  %vm69_vm9 = vcmp.eq.s32.totalorder %v45_v5, %v1154_v9  ;;  %p1094_p13 = por %p1093_p12, %p1092_p11 }
  0x22   :  { %908 = vmatprep.subr.msk.mxu0 %vm1161_vm5, %v1117_v12  ;;  %vm1172_vm10 = vmor %vm59_vm3, %vm71_vm4  ;;  %vm56_vm11 = vcmp.eq.s32.totalorder %v44_v6, %v1152_v8  ;;  %vm68_vm12 = vcmp.eq.s32.totalorder %v44_v6, %v1154_v9  ;;  %v811_v15 = vsel %vm1161_vm5, 1.0, %v1118_v14  ;;  %vm55_vm13 = vcmp.eq.s32.totalorder %v43_v7, %v1152_v8 }
  0x23   :  { %909 = vmatpush3.msk.msra.mxu0 %vm1161_vm5, %v1117_v12  ;;  %vm1185_vm14 = vmor %vm58_vm6, %vm70_vm7  ;;  %v1189_v17 = vsub.f32 %v811_v15, %v811_v15  ;;  %vm67_vm15 = vcmp.eq.s32.totalorder %v43_v7, %v1154_v9  ;;  %v810_v18 = vsel %vm1172_vm10, 1.0, %v1118_v14  ;;  %vm54_vm1 = vcmp.eq.s32.totalorder %v42_v10, %v1152_v8  ;;  %p1095_p0 = pnand %p1094_p13, %p1088_p10 }
  0x24   :  { %910 = vmatprep.subr.msk.mxu0 %vm1172_vm10, %v1117_v12  ;;  %vm1203_vm2 = vmor %vm57_vm8, %vm69_vm9  ;;  %v1207_v22 = vsub.f32 %v810_v18, %v810_v18  ;;  %vm66_vm3 = vcmp.eq.s32.totalorder %v42_v10, %v1154_v9  ;;  %v809_v23 = vsel %vm1185_vm14, 1.0, %v1118_v14  ;;  %vm53_vm4 = vcmp.eq.s32.totalorder %v1144_v1, %v1152_v8 }
  0x25   :  { %911 = vmatpush3.msk.msra.mxu0 %vm1172_vm10, %v1117_v12  ;;  %vm1222_vm6 = vmor %vm56_vm11, %vm68_vm12  ;;  %v1227_v25 = vand.u32 4294901760, %v1189_v17  ;;  %v1229_v26 = vsub.f32 %v809_v23, %v809_v23  ;;  %vm65_vm7 = vcmp.eq.s32.totalorder %v1144_v1, %v1154_v9  ;;  %v808_v27 = vsel %vm1203_vm2, 1.0, %v1118_v14 }
  0x26   :  { %912 = vmatprep.subr.msk.mxu0 %vm1185_vm14, %v1117_v12  ;;  %vm1243_vm8 = vmor %vm55_vm13, %vm67_vm15  ;;  %v1248_v29 = vand.u32 4294901760, %v1207_v22  ;;  %v1250_v30 = vsub.f32 %v808_v27, %v808_v27  ;;  %v807_v40 = vsel %vm1222_vm6, 1.0, %v1118_v14  ;;  %v1297_v45 = vsub.f32 %v106_v32, %v1264_v36 }
  0x27   :  { %913 = vmatpush3.msk.msra.mxu0 %vm1185_vm14, %v1117_v12  ;;  %v247_v33 = vsub.f32 %v1189_v17, %v1227_v25  ;;  %v1260_v34 = vand.u32 4294901760, %v1229_v26  ;;  %vm1275_vm9 = vmor %vm54_vm1, %vm66_vm3  ;;  %v806_v41 = vsel %vm1243_vm8, 1.0, %v1118_v14  ;;  %v1315_v49 = vsub.f32 %v807_v40, %v807_v40 }
  0x28   :  { %914 = vmatprep.subr.msk.mxu0 %vm1203_vm2, %v1117_v12  ;;  %v254_v37 = vsub.f32 %v1207_v22, %v1248_v29  ;;  %v1280_v39 = vand.u32 4294901760, %v1250_v30  ;;  %vm1309_vm11 = vmor %vm53_vm4, %vm65_vm7  ;;  %v1317_v50 = vsub.f32 %v806_v41, %v806_v41  ;;  %v189_v53 = vand.u32 4294901760, %v1294_v44 }
  0x29   :  { %915 = vmatpush3.msk.msra.mxu0 %vm1203_vm2, %v1117_v12  ;;  %v248_v42 = vand.u32 4294901760, %v247_v33  ;;  %v261_v43 = vsub.f32 %v1229_v26, %v1260_v34  ;;  %v199_v54 = vand.u32 4294901760, %v1297_v45  ;;  %v805_v55 = vsel %vm1275_vm9, 1.0, %v1118_v14 }
  0x2a   :  { %916 = vmatprep.subr.msk.mxu0 %vm1222_vm6, %v1117_v12  ;;  %v255_v46 = vand.u32 4294901760, %v254_v37  ;;  %v268_v48 = vsub.f32 %v1250_v30, %v1280_v39  ;;  %v1331_v57 = vand.u32 4294901760, %v1315_v49  ;;  %v1334_v58 = vand.u32 4294901760, %v1317_v50 }
  0x2b   :  { %917 = vmatpush3.msk.msra.mxu0 %vm1222_vm6, %v1117_v12  ;;  %930 = vmatprep.subr.mxu1 %v248_v42  ;;  %v262_v52 = vand.u32 4294901760, %v261_v43  ;;  %v1336_v59 = vsub.f32 %v805_v55, %v805_v55  ;;  %v190_v61 = vsub.f32 %v1294_v44, %v189_v53  ;;  %v200_v62 = vsub.f32 %v1297_v45, %v199_v54 }
  0x2c   :  { %918 = vmatprep.subr.msk.mxu0 %vm1243_vm8, %v1117_v12  ;;  %931 = vmatpush3.msra.mxu1 %v248_v42  ;;  %v269_v56 = vand.u32 4294901760, %v268_v48  ;;  %v804_v63 = vsel %vm1309_vm11, 1.0, %v1118_v14  ;;  %v275_v1 = vsub.f32 %v1315_v49, %v1331_v57  ;;  %v282_v2 = vsub.f32 %v1317_v50, %v1334_v58 }
  0x2d   :  { %919 = vmatpush3.msk.msra.mxu0 %vm1243_vm8, %v1117_v12  ;;  %932 = vmatprep.subr.mxu1 %v255_v46  ;;  %v1359_v3 = vand.u32 4294901760, %v1336_v59  ;;  %v294_v4 = vsub.f32 %v804_v63, %v804_v63  ;;  %v191_v5 = vand.u32 4294901760, %v190_v61  ;;  %v201_v6 = vand.u32 4294901760, %v200_v62 }
  0x2e   :  { %920 = vmatprep.subr.msk.mxu0 %vm1275_vm9, %v1117_v12  ;;  %933 = vmatpush3.msra.mxu1 %v255_v46  ;;  %v1364_v7 = vand.u32 4294901760, %v109_v0  ;;  %v112_v8 = vsel %vm101_vm0, %v100_v60, 0  ;;  %v276_v9 = vand.u32 4294901760, %v275_v1  ;;  %v283_v19 = vand.u32 4294901760, %v282_v2 }
  0x2f   :  { %921 = vmatpush3.msk.msra.mxu0 %vm1275_vm9, %v1117_v12  ;;  %934 = vmatprep.subr.mxu1 %v262_v52  ;;  %v289_v10 = vsub.f32 %v1336_v59, %v1359_v3  ;;  %v1372_v14 = vand.u32 4294901760, %v294_v4  ;;  %v1380_v18 = vand.u32 4294901760, %v112_v8 }
  0x30   :  { %922 = vmatprep.subr.msk.mxu0 %vm1309_vm11, %v1117_v12  ;;  %935 = vmatpush3.msra.mxu1 %v262_v52  ;;  %v1378_v15 = vsub.f32 %v109_v0, %v1364_v7 }
  0x31   :  { %923 = vmatpush3.msk.msra.mxu0 %vm1309_vm11, %v1117_v12  ;;  %936 = vmatprep.subr.mxu1 %v269_v56  ;;  %v296_v20 = vsub.f32 %v294_v4, %v1372_v14  ;;  %v1386_v27 = vsub.f32 %v112_v8, %v1380_v18  ;;  %v290_v31 = vand.u32 4294901760, %v289_v10 }
  0x32   :  { %924 = vmatprep.mubr.f32.mxu0 %v191_v5  ;;  %937 = vmatpush3.msra.mxu1 %v269_v56  ;;  %v209_v23 = vand.u32 4294901760, %v1378_v15 }
  0x33   :  { %952 = vmatprep.subr.mxu0 %v1189_v17  ;;  %925 = vmatmul.mubr.f32.vlgmr.msra.gmra.mxu0 %v201_v6  ;;  %v219_v32 = vand.u32 4294901760, %v1386_v27  ;;  %v297_v33 = vand.u32 4294901760, %v296_v20 }
  0x34   :  { %938 = vmatprep.subr.mxu1 %v276_v9  ;;  %953 = vmatpush3.msra.mxu0 %v1189_v17  ;;  %v210_v37 = vsub.f32 %v1378_v15, %v209_v23 }
  0x35   :  { %939 = vmatpush3.msra.mxu1 %v276_v9  ;;  %954 = vmatprep.subr.mxu0 %v1207_v22  ;;  %v220_v17 = vsub.f32 %v1386_v27, %v219_v32 }
  0x36   :  { %940 = vmatprep.subr.mxu1 %v283_v19  ;;  %955 = vmatpush3.msra.mxu0 %v1207_v22  ;;  %v211_v22 = vand.u32 4294901760, %v210_v37 }
  0x37   :  { %941 = vmatpush3.msra.mxu1 %v283_v19  ;;  %956 = vmatprep.subr.mxu0 %v1229_v26  ;;  %v221_v40 = vand.u32 4294901760, %v220_v17 }
  0x38   :  { %942 = vmatprep.subr.mxu1 %v290_v31  ;;  %957 = vmatpush3.msra.mxu0 %v1229_v26 }
  0x39   :  { %943 = vmatpush3.msra.mxu1 %v290_v31  ;;  %958 = vmatprep.subr.mxu0 %v1250_v30 }
  0x3a   :  { %944 = vmatprep.subr.mxu1 %v297_v33  ;;  %959 = vmatpush3.msra.mxu0 %v1250_v30 }
  0x3b   :  { %945 = vmatpush3.msra.mxu1 %v297_v33  ;;  %960 = vmatprep.subr.mxu0 %v1315_v49 }
  0x3c   :  { %947 = vmatmul.mubr.f32.vlgmr.msra.gmra.mxu1 %v1264_v36  ;;  %961 = vmatpush3.msra.mxu0 %v1315_v49 }
  0x3d   :  { %974 = vmatprep.subr.msk.mxu1 %vm1161_vm5, %v1117_v12  ;;  %962 = vmatprep.subr.mxu0 %v1317_v50 }
  0x3e   :  { %975 = vmatpush3.msk.msra.mxu1 %vm1161_vm5, %v1117_v12  ;;  %927 = vmatprep.mubr.f32.mxu0 %v211_v22 }
  0x3f   :  { %963 = vmatpush3.msra.mxu0 %v1317_v50  ;;  %976 = vmatprep.subr.msk.mxu1 %vm1172_vm10, %v1117_v12 }
  0x40   :  { %928 = vmatmul.mubr.f32.gmra.mxu0 %v221_v40  ;;  %964 = vmatprep.subr.mxu0 %v1336_v59 }
  0x41   :  { %977 = vmatpush3.msk.msra.mxu1 %vm1172_vm10, %v1117_v12  ;;  %965 = vmatpush3.msra.mxu0 %v1336_v59 }
  0x42   :  { %978 = vmatprep.subr.msk.mxu1 %vm1185_vm14, %v1117_v12  ;;  %966 = vmatprep.subr.mxu0 %v294_v4 }
  0x43   :  { %979 = vmatpush3.msk.msra.mxu1 %vm1185_vm14, %v1117_v12  ;;  %967 = vmatpush3.msra.mxu0 %v294_v4 }
  0x44   :  { %968 = vmatprep.mubr.f32.mxu0 %v1294_v44  ;;  %980 = vmatprep.subr.msk.mxu1 %vm1203_vm2, %v1117_v12 }
  0x45   :  { %969 = vmatmul.mubr.f32.vlgmr.msra.gmra.mxu0 %v1297_v45  ;;  %981 = vmatpush3.msk.msra.mxu1 %vm1203_vm2, %v1117_v12 }
  0x46   :  { %996 = vmatprep.subr.mxu0 %v1227_v25  ;;  %949 = vmatprep.mubr.f32.mxu1 %v1364_v7 }
  0x47   :  { %982 = vmatprep.subr.msk.mxu1 %vm1222_vm6, %v1117_v12  ;;  %997 = vmatpush3.msra.mxu0 %v1227_v25 }
  0x48   :  { %950 = vmatmul.mubr.f32.gmra.mxu1 %v1380_v18  ;;  %998 = vmatprep.subr.mxu0 %v1248_v29 }
  0x49   :  { %983 = vmatpush3.msk.msra.mxu1 %vm1222_vm6, %v1117_v12  ;;  %971 = vmatprep.mubr.f32.mxu0 %v1378_v15 }
  0x4a   :  { %984 = vmatprep.subr.msk.mxu1 %vm1243_vm8, %v1117_v12  ;;  %999 = vmatpush3.msra.mxu0 %v1248_v29 }
  0x4b   :  { %972 = vmatmul.mubr.f32.gmra.mxu0 %v1386_v27  ;;  %985 = vmatpush3.msk.msra.mxu1 %vm1243_vm8, %v1117_v12 }
  0x4c   :  { %1000 = vmatprep.subr.mxu0 %v1260_v34  ;;  %986 = vmatprep.subr.msk.mxu1 %vm1275_vm9, %v1117_v12 }
  0x4d   :  { %1001 = vmatpush3.msra.mxu0 %v1260_v34  ;;  %987 = vmatpush3.msk.msra.mxu1 %vm1275_vm9, %v1117_v12 }
  0x4e   :  { %1002 = vmatprep.subr.mxu0 %v1280_v39  ;;  %988 = vmatprep.subr.msk.mxu1 %vm1309_vm11, %v1117_v12 }
  0x4f   :  { %1003 = vmatpush3.msra.mxu0 %v1280_v39  ;;  %989 = vmatpush3.msk.msra.mxu1 %vm1309_vm11, %v1117_v12 }
  0x50   :  { %990 = vmatprep.mubr.f32.mxu1 %v189_v53  ;;  %1004 = vmatprep.subr.mxu0 %v1331_v57 }
  0x51   :  { %991 = vmatmul.mubr.f32.vlgmr.msra.gmra.mxu1 %v199_v54  ;;  %1005 = vmatpush3.msra.mxu0 %v1331_v57 }
  0x52   :  { %1018 = vmatprep.subr.msk.mxu1 %vm1161_vm5, %v1117_v12  ;;  %1006 = vmatprep.subr.mxu0 %v1334_v58 }
  0x53   :  { %1019 = vmatpush3.msk.msra.mxu1 %vm1161_vm5, %v1117_v12  ;;  %1007 = vmatpush3.msra.mxu0 %v1334_v58 }
  0x54   :  { %1020 = vmatprep.subr.msk.mxu1 %vm1172_vm10, %v1117_v12  ;;  %993 = vmatprep.mubr.f32.mxu1 %v209_v23 }
  0x55   :  { %1008 = vmatprep.subr.mxu0 %v1359_v3  ;;  %1021 = vmatpush3.msk.msra.mxu1 %vm1172_vm10, %v1117_v12 }
  0x56   :  { %994 = vmatmul.mubr.f32.gmra.mxu1 %v219_v32  ;;  %1009 = vmatpush3.msra.mxu0 %v1359_v3 }
  0x57   :  { %1022 = vmatprep.subr.msk.mxu1 %vm1185_vm14, %v1117_v12  ;;  %1010 = vmatprep.subr.mxu0 %v1372_v14 }
  0x58   :  { %1023 = vmatpush3.msk.msra.mxu1 %vm1185_vm14, %v1117_v12  ;;  %1011 = vmatpush3.msra.mxu0 %v1372_v14 }
  0x59   :  { %1012 = vmatprep.mubr.f32.mxu0 %v1262_v35  ;;  %1024 = vmatprep.subr.msk.mxu1 %vm1203_vm2, %v1117_v12 }
  0x5a   :  { %1013 = vmatmul.mubr.f32.vlgmr.msra.gmra.mxu0 %v1264_v36  ;;  %1025 = vmatpush3.msk.msra.mxu1 %vm1203_vm2, %v1117_v12 }
  0x5b   :  { %1026 = vmatprep.subr.msk.mxu1 %vm1222_vm6, %v1117_v12  ;;  %1015 = vmatprep.mubr.f32.mxu0 %v1364_v7 }
  0x5c   :  { %1027 = vmatpush3.msk.msra.mxu1 %vm1222_vm6, %v1117_v12  ;;  %1034 = vmatprep.mubr.f32.mxu1 %v1262_v35 }
  0x5d   :  { %1028 = vmatprep.subr.msk.mxu1 %vm1243_vm8, %v1117_v12 }
  0x5e   :  { %1016 = vmatmul.mubr.f32.gmra.mxu0 %v1380_v18  ;;  %1029 = vmatpush3.msk.msra.mxu1 %vm1243_vm8, %v1117_v12 }
  0x5f   :  { %1030 = vmatprep.subr.msk.mxu1 %vm1275_vm9, %v1117_v12 }
  0x60   :  { %1031 = vmatpush3.msk.msra.mxu1 %vm1275_vm9, %v1117_v12 }
  0x61   :  { %1032 = vmatprep.subr.msk.mxu1 %vm1309_vm11, %v1117_v12 }
  0x62   :  { %1033 = vmatpush3.msk.msra.mxu1 %vm1309_vm11, %v1117_v12 }
  0x63   :  { %1035 = vmatmul.mubr.f32.vlgmr.msra.gmra.mxu1 %v1264_v36 }
  0x64   :  { %1037 = vmatprep.mubr.f32.mxu1 %v1364_v7 }
  0x67   :  { %1038 = vmatmul.mubr.f32.gmra.mxu1 %v1380_v18 }
  0xf3   :  { %v926_v11 = vpop.f32.mrf.mxu0 }
  0xf5   :  { %v193_v13 = vpop.f32.mrf.mxu0 }
  0xfc   :  { %v948_v24 = vpop.f32.mrf.mxu1 }
  0xfd   :  { %v341_v36 = vadd.f32 %v948_v24, %v926_v11 }
  0xfe   :  { %v334_v26 = vpop.f32.mrf.mxu1 }
  0xff   :  { %v335_v43 = vadd.f32 %v334_v26, %v193_v13 }
 0x100   :  { %v929_v16 = vpop.f32.mrf.mxu0 }
 0x102   :  { %v213_v21 = vpop.f32.mrf.mxu0 }
 0x105   :  { %v970_v25 = vpop.f32.mrf.mxu0 }
 0x106   :  { %v448_v44 = vadd.f32 %v970_v25, %v341_v36 }
 0x107   :  { %v440_v29 = vpop.f32.mrf.mxu0 }
 0x108   :  { %v951_v28 = vpop.f32.mrf.mxu1  ;;  %v441_v46 = vadd.f32 %v440_v29, %v335_v43 }
 0x109   :  { %v353_v45 = vadd.f32 %v951_v28, %v929_v16 }
 0x10a   :  { %v346_v30 = vpop.f32.mrf.mxu1 }
 0x10b   :  { %v973_v34 = vpop.f32.mrf.mxu0  ;;  %v347_v47 = vadd.f32 %v346_v30, %v213_v21 }
 0x10c   :  { %v462_v51 = vadd.f32 %v973_v34, %v353_v45 }
 0x10d   :  { %v454_v38 = vpop.f32.mrf.mxu0 }
 0x10e   :  { %v455_v55 = vadd.f32 %v454_v38, %v347_v47 }
 0x111   :  { %v992_v35 = vpop.f32.mrf.mxu1 }
 0x112   :  { %v551_v48 = vadd.f32 %v992_v35, %v448_v44 }
 0x113   :  { %v542_v12 = vpop.f32.mrf.mxu1 }
 0x114   :  { %v543_v52 = vadd.f32 %v542_v12, %v441_v46 }
 0x116   :  { %v995_v41 = vpop.f32.mrf.mxu1 }
 0x117   :  { %v567_v56 = vadd.f32 %v995_v41, %v462_v51 }
 0x118   :  { %v558_v49 = vpop.f32.mrf.mxu1 }
 0x119   :  { %v559_v61 = vadd.f32 %v558_v49, %v455_v55 }
 0x11a   :  { %v1014_v39 = vpop.f32.mrf.mxu0 }
 0x11b   :  { %v668_v53 = vadd.f32 %v1014_v39, %v551_v48 }
 0x11c   :  { %v661_v42 = vpop.f32.mrf.mxu0 }
 0x11d   :  { %v662_v57 = vadd.f32 %v661_v42, %v543_v52 }
 0x11e   :  { %v1017_v50 = vpop.f32.mrf.mxu0 }
 0x11f   :  { %v680_v62 = vadd.f32 %v1017_v50, %v567_v56 }
 0x120   :  { %v673_v59 = vpop.f32.mrf.mxu0 }
 0x121   :  { %v674_v1 = vadd.f32 %v673_v59, %v559_v61 }
 0x123   :  { %v1036_v54 = vpop.f32.mrf.mxu1 }
 0x124   :  { %v765_v58 = vadd.f32 %v1036_v54, %v668_v53 }
 0x125   :  { %v758_v60 = vpop.f32.mrf.mxu1 }
 0x126   :  { %781 = vst [vmem:[#allocation7 + $0x8] sm:$0xff] %v765_v58  ;;  %v759_v63 = vadd.f32 %v758_v60, %v662_v57 }
 0x127   :  { %v1039_v0 = vpop.f32.mrf.mxu1 }
 0x128   :  { %780 = vst [vmem:[#allocation7] sm:$0xff] %v759_v63  ;;  %v777_v2 = vadd.f32 %v1039_v0, %v680_v62 }
 0x129   :  { %v770_v3 = vpop.f32.mrf.mxu1 }
 0x12a   :  { %783 = vst [vmem:[#allocation7 + $0x18] sm:$0xff] %v777_v2  ;;  %v771_v4 = vadd.f32 %v770_v3, %v674_v1 }
 0x12c   :  { %782 = vst [vmem:[#allocation7 + $0x10] sm:$0xff] %v771_v4 }
 0x12d   :  { %1098 = shalt.err (!%p1095_p0)
}
 0x12e   :  { %795 = dma.vmem_to_hbm [thread:$0]  %s790_s1, 512, %s1551_s2, [#allocation4], %s1115_s17, %s1115_s17, %s1116_s18  }
 0x12f   :  { %1111 = dma.done.wait [#allocation4], 512  }
 0x130   :  { %1112 = vsyncadd [#allocation4], 4294966784 }
 0x131   :  { %799 = vsyncpa [#allocation3], 1 }
 0x132   :  { %800 = vsyncpa [#allocation6], 1 }
 0x133   :  { %801 = vsyncpa [#allocation4], 1 }

</bundles_post_ra>
